<compile_context>
chip_gen: v7x
topology: tpu7x:2x2x1
jax: 0.10.0
libtpu: 0.0.40
codegen_flags: <defaults>
</compile_context>

<pallas_src>
import functools

import jax
import jax.numpy as jnp
from jax import lax
from jax.experimental import pallas as pl


def _map_embed_kernel(col_ref, row_ref, m_ref, *, h, w):
    """col_ref / row_ref: full [60, F] embedding tables (VMEM).
       m_ref: [2F, H*W] channel-major, flat-spatial (lane-dense) map embedding.
    """
    feat = col_ref.shape[1]
    out_dt = m_ref.dtype
    tbl_dt = col_ref.dtype

    # Rows 1..W / 1..H of the tables (the module's arange+1 indexing),
    # spatial-major.  Static sublane slices -- no wrapper-side slice/transpose.
    col_s = col_ref[1:1 + w, :]                                   # [W, F]
    row_s = row_ref[1:1 + h, :]                                   # [H, F]

    # One-hot expansion matrices (compile-time structure, built in-register).
    #   T[c, r*W + c] = 1  ->  m[f,      r*W+c] = col_s[c, f]
    #   E[r, r*W + c] = 1  ->  m[F + f,  r*W+c] = row_s[r, f]
    eye_w = (lax.broadcasted_iota(jnp.int32, (w, w), 0) ==
             lax.broadcasted_iota(jnp.int32, (w, w), 1)).astype(tbl_dt)
    # Tiny [W, H*W] helper (eye tiled along lanes), not the [F, H*W] slab.
    t_mat = jnp.concatenate([eye_w] * h, axis=1)                  # [W, H*W]

    s_idx = lax.broadcasted_iota(jnp.int32, (h, h * w), 1)
    r_idx = lax.broadcasted_iota(jnp.int32, (h, h * w), 0)
    e_mat = ((s_idx >= r_idx * w) &
             (s_idx < (r_idx + 1) * w)).astype(tbl_dt)            # [H, H*W]

    # MXU one-hot expansion: contract dim 0 of both operands (== lhs.T @ rhs,
    # flash-bwd dv pattern), f32 accumulate (exact for one-hot weights).
    # One unmasked full-lane store per half (feat is sublane-aligned).
    dn = (((0,), (0,)), ((), ()))
    m_ref[0:feat, :] = lax.dot_general(
        col_s, t_mat, dn, preferred_element_type=jnp.float32).astype(out_dt)
    m_ref[feat:2 * feat, :] = lax.dot_general(
        row_s, e_mat, dn, preferred_element_type=jnp.float32).astype(out_dt)


def position_embedding_with_pose_token(x, row_weight, col_weight, pose_weight):
    """x: [B, C, H, W] (only B, H, W are read).
    Returns (p_emb [B, 2F], m_emb [B, 2F, H, W]) matching the PyTorch module.
    Call inside the consumer's jit so the batch broadcasts stay lazy."""
    b = x.shape[0]
    h, w = x.shape[-2], x.shape[-1]
    feat = row_weight.shape[1]
    dtype = row_weight.dtype
    itemsize = jnp.dtype(dtype).itemsize

    # Same implicit constraint as the PyTorch module (Embedding(60, F) indexed
    # with arange+1): spatial sizes must stay within the table.
    assert h + 1 <= row_weight.shape[0] and w + 1 <= col_weight.shape[0]

    bytes_accessed = (row_weight.size + col_weight.size
                      + 2 * feat * h * w) * itemsize

    m_flat = pl.pallas_call(
        functools.partial(_map_embed_kernel, h=h, w=w),
        out_shape=jax.ShapeDtypeStruct((2 * feat, h * w), dtype),
        cost_estimate=pl.CostEstimate(
            flops=0, transcendentals=0, bytes_accessed=int(bytes_accessed)),
    )(col_weight, row_weight)

    # Pose token embedding: pose_token_embed[0] duplicated into both halves.
    # Zero-FLOP and batch-free -> plain jnp in the wrapper (no kernel output).
    pose_row = pose_weight[0]                                     # [F]
    p_single = jnp.concatenate([pose_row, pose_row], axis=0)      # [2F]

    # Lazy batch broadcasts (broadcast_in_dim); reshape of m_flat is
    # metadata-only (row-major contiguous).
    p_emb = jnp.broadcast_to(p_single[None, :], (b, 2 * feat))
    m_emb = jnp.broadcast_to(
        m_flat.reshape(2 * feat, h, w)[None], (b, 2 * feat, h, w))
    return p_emb, m_emb


if __name__ == "__main__":
    NUM_POS_FEATS = 32          # num_pos_feats (small for the test)
    B, C, H, W = 2, 4, 16, 16   # input x shape (NCHW)

    key = jax.random.PRNGKey(0)
    k_row, k_col, k_pose, k_x = jax.random.split(key, 4)

    # nn.init.uniform_ -> U[0, 1), tables of shape [60, num_pos_feats]
    row_w = jax.random.uniform(k_row, (60, NUM_POS_FEATS), dtype=jnp.float32)
    col_w = jax.random.uniform(k_col, (60, NUM_POS_FEATS), dtype=jnp.float32)
    pose_w = jax.random.uniform(k_pose, (60, NUM_POS_FEATS), dtype=jnp.float32)

    x = jax.random.normal(k_x, (B, C, H, W), dtype=jnp.float32)

    p_emb, m_emb = position_embedding_with_pose_token(x, row_w, col_w, pose_w)
    jax.block_until_ready((p_emb, m_emb))

    # Reference check (plain JAX, mirrors the PyTorch forward exactly)
    i = jnp.arange(W) + 1
    j = jnp.arange(H) + 1
    x_emb_ref = col_w[i]                                   # [W, F]
    y_emb_ref = row_w[j]                                   # [H, F]
    p_expected = jnp.tile(
        jnp.concatenate([pose_w[0], pose_w[0]])[None, :], (B, 1))
    m_expected = jnp.concatenate(
        [jnp.broadcast_to(x_emb_ref[None], (H, W, NUM_POS_FEATS)),
         jnp.broadcast_to(y_emb_ref[:, None], (H, W, NUM_POS_FEATS))],
        axis=-1,
    )
    m_expected = jnp.broadcast_to(
        jnp.transpose(m_expected, (2, 0, 1))[None],
        (B, 2 * NUM_POS_FEATS, H, W),
    )

    assert p_emb.shape == (B, 2 * NUM_POS_FEATS)
    assert m_emb.shape == (B, 2 * NUM_POS_FEATS, H, W)
    assert jnp.allclose(p_emb, p_expected)
    assert jnp.allclose(m_emb, m_expected)

    print("KERNEL_OK")
</pallas_src>

<mosaic_0001>
module attributes {stable_mosaic.version = 11 : i64} {
  func.func @_map_embed_kernel(%arg0: memref<60x32xf32, #tpu.memory_space<vmem>>, %arg1: memref<60x32xf32, #tpu.memory_space<vmem>>, %arg2: memref<64x256xf32, #tpu.memory_space<vmem>>) attributes {dimension_semantics = [], scalar_prefetch = 0 : i64, scratch_operands = 0 : i64, tpu.core_type = #tpu.core_type<tc>} {
    %c1 = arith.constant 1 : index
    %c0 = arith.constant 0 : index
    %0 = vector.load %arg0[%c1, %c0] : memref<60x32xf32, #tpu.memory_space<vmem>>, vector<16x32xf32>
    %c1_0 = arith.constant 1 : index
    %c0_1 = arith.constant 0 : index
    %1 = vector.load %arg1[%c1_0, %c0_1] : memref<60x32xf32, #tpu.memory_space<vmem>>, vector<16x32xf32>
    %2 = tpu.iota {dimensions = array<i32: 0>} : vector<16x16xi32>
    %3 = tpu.iota {dimensions = array<i32: 1>} : vector<16x16xi32>
    %4 = arith.cmpi eq, %2, %3 : vector<16x16xi32>
    %5 = arith.extui %4 : vector<16x16xi1> to vector<16x16xi32>
    %6 = arith.sitofp %5 : vector<16x16xi32> to vector<16x16xf32>
    %7 = tpu.concatenate %6, %6, %6, %6, %6, %6, %6, %6, %6, %6, %6, %6, %6, %6, %6, %6 in 1 : vector<16x16xf32>, vector<16x16xf32>, vector<16x16xf32>, vector<16x16xf32>, vector<16x16xf32>, vector<16x16xf32>, vector<16x16xf32>, vector<16x16xf32>, vector<16x16xf32>, vector<16x16xf32>, vector<16x16xf32>, vector<16x16xf32>, vector<16x16xf32>, vector<16x16xf32>, vector<16x16xf32>, vector<16x16xf32> -> vector<16x256xf32>
    %8 = tpu.iota {dimensions = array<i32: 1>} : vector<16x256xi32>
    %9 = tpu.iota {dimensions = array<i32: 0>} : vector<16x256xi32>
    %c16_i32 = arith.constant 16 : i32
    %10 = vector.broadcast %c16_i32 : i32 to vector<16x256xi32>
    %11 = arith.muli %9, %10 : vector<16x256xi32>
    %12 = arith.cmpi sge, %8, %11 : vector<16x256xi32>
    %c1_i32 = arith.constant 1 : i32
    %13 = vector.broadcast %c1_i32 : i32 to vector<16x256xi32>
    %14 = arith.addi %9, %13 : vector<16x256xi32>
    %c16_i32_2 = arith.constant 16 : i32
    %15 = vector.broadcast %c16_i32_2 : i32 to vector<16x256xi32>
    %16 = arith.muli %14, %15 : vector<16x256xi32>
    %17 = arith.cmpi slt, %8, %16 : vector<16x256xi32>
    %18 = arith.andi %12, %17 : vector<16x256xi1>
    %19 = arith.extui %18 : vector<16x256xi1> to vector<16x256xi32>
    %20 = arith.sitofp %19 : vector<16x256xi32> to vector<16x256xf32>
    %cst = arith.constant dense<0.000000e+00> : vector<32x256xf32>
    %21 = tpu.matmul %0, %7, %cst {dimension_numbers = #tpu.dot_dimension_numbers<[0], [0], [1], [1], [0, 1, 1, 1], [], []>} : vector<16x32xf32>, vector<16x256xf32>, vector<32x256xf32> -> vector<32x256xf32>
    %c0_3 = arith.constant 0 : index
    %c0_4 = arith.constant 0 : index
    %22 = vector.load %arg2[%c0_3, %c0_4] : memref<64x256xf32, #tpu.memory_space<vmem>>, vector<32x256xf32>
    tpu.vector_store %arg2[%c0_3, %c0_4], %21 {strides = array<i32>} : memref<64x256xf32, #tpu.memory_space<vmem>>, vector<32x256xf32>,
    %cst_5 = arith.constant dense<0.000000e+00> : vector<32x256xf32>
    %23 = tpu.matmul %1, %20, %cst_5 {dimension_numbers = #tpu.dot_dimension_numbers<[0], [0], [1], [1], [0, 1, 1, 1], [], []>} : vector<16x32xf32>, vector<16x256xf32>, vector<32x256xf32> -> vector<32x256xf32>
    %c32 = arith.constant 32 : index
    %c0_6 = arith.constant 0 : index
    %24 = vector.load %arg2[%c32, %c0_6] : memref<64x256xf32, #tpu.memory_space<vmem>>, vector<32x256xf32>
    tpu.vector_store %arg2[%c32, %c0_6], %23 {strides = array<i32>} : memref<64x256xf32, #tpu.memory_space<vmem>>, vector<32x256xf32>,
    return
  }
}

</mosaic_0001>

<bundles_post_ra>
// kernel: tpu_custom_call.1
= control target key start
LH: loop header
LB: loop body
LE: loop exit
PB: predicated region body
PF: predicated region fallthrough
CT: control target
= control target key end

     0   :  { %v16_v0 = vlaneseq  ;;  %v513_v1 = vmov 0.0   ;;  %s591_s0 = inlined_call_operand.vmem [shape: f32[60,32], index: 0, kind: input, shape index: {}]   ;;  %s592_s1 = inlined_call_operand.vmem [shape: f32[60,32], index: 1, kind: input, shape index: {}]   ;;  %s593_s2 = inlined_call_operand.hbm [shape: f32[64,256], index: 2, kind: output, shape index: {}]  }
   0x1   :  { %368 = vmatprep.mubr.f32.mxu1 %v513_v1  ;;  %227 = vmatprep.mubr.f32.mxu0 %v513_v1 }
   0x2   :  { %v17_v2 = vshrl.u32 %v16_v0, 7  ;;  %v20_v3 = vand.u32 127, %v16_v0 }
   0x3   :  { %7 = vsyncpa [#allocation3], 0  ;;  %s514_s9 = smov 48   ;;  %s515_s10 = smov 16   ;;  %v521_v16 = vmov 1.0|1.0  }
   0x4   :  { %v18_v4 = vadd.s32 8, %v17_v2  ;;  %vm21_vm0 = vcmp.eq.s32.totalorder %v17_v2, %v20_v3  ;;  %s516_s11 = smov 64   ;;  %s517_s12 = smov 32   ;;  %v92_v8 = vadd.s32 128, %v20_v3  ;;  %v93_v9 = vmul.u32 16, %v17_v2  ;;  %v14_v17 = vld [vmem:[%s592_s1 + $0x1] sm:$0xff] }
   0x5   :  { %v417_v5 = vsel %vm21_vm0, 1.0, %v513_v1  ;;  %v99_v11 = vadd.s32 1, %v17_v2  ;;  %s518_s13 = smov 96   ;;  %s519_s14 = smov 80   ;;  %v15_v18 = vld [vmem:[%s592_s1 + $0x9] sm:$0xff]  ;;  %v12_v19 = vld [vmem:[%s591_s0 + $0x1] sm:$0xff] }
   0x6   :  { %vm22_vm1 = vcmp.eq.s32.totalorder %v18_v4, %v20_v3  ;;  %v94_v10 = vmul.u32 16, %v18_v4  ;;  %v100_v12 = vadd.s32 1, %v18_v4  ;;  %vm544_vm2 = vcmp.ge.s32.totalorder %v92_v8, %v93_v9  ;;  %s520_s15 = smov 112   ;;  %v13_v20 = vld [vmem:[%s591_s0 + $0x9] sm:$0xff]  ;;  %s522_s0 = smov [#allocation2]  }
   0x7   :  { %v418_v6 = vsel %vm22_vm1, 1.0, %v513_v1  ;;  %v101_v14 = vmul.u32 16, %v99_v11  ;;  %vm95_vm7 = vcmp.ge.s32.totalorder %v20_v3, %v93_v9  ;;  %vm71_vm0 = vcmask 130048   ;;  %s406_s1 = sshll.u32 %s522_s0, 4  ;;  %s407_s1 = int_to_ptr.vmem [resolvable:$true] %s406_s1 }
   0x8   :  { %v464_v7 = vpack.i.bf16 %v418_v6, %v417_v5  ;;  %vm98_vm3 = vcmp.ge.s32.totalorder %v92_v8, %v94_v10  ;;  %v102_v15 = vmul.u32 16, %v100_v12  ;;  %vm97_vm10 = vcmp.ge.s32.totalorder %v20_v3, %v94_v10  ;;  %s489_s24 = scalar_lea.vmem %s407_s1, 2048  ;;  %p494_p1 = scmp.lt.s32.totalorder %s407_s1, %s407_s1 }
   0x9   :  { %vm104_vm4 = vcmp.lt.s32.totalorder %v92_v8, %v101_v14  ;;  %vm103_vm8 = vcmp.lt.s32.totalorder %v20_v3, %v101_v14  ;;  %vm74_vm1 = vcmask 261120   ;;  %p490_p0 = scmp.ne.s32.totalorder %s407_s1, %s489_s24  ;;  %p495_p2 = scmp.lt.s32.totalorder %s489_s24, %s489_s24 }
   0xa   :  { %465 = vrot.lane.b32.xlu1 %v464_v7, %s514_s9  ;;  %455 = vrot.lane.b32.xlu0 %v464_v7, %s515_s10  ;;  %vm106_vm5 = vcmp.lt.s32.totalorder %v92_v8, %v102_v15  ;;  %vm108_vm6 = vmand %vm544_vm2, %vm104_vm4  ;;  %vm105_vm11 = vcmp.lt.s32.totalorder %v20_v3, %v102_v15  ;;  %vm77_vm2 = vcmask 392192   ;;  %vm83_vm4 = vcmask 654336  }
   0xb   :  { %vm110_vm9 = vmand %vm98_vm3, %vm106_vm5  ;;  %vm80_vm3 = vcmask 523264   ;;  %vm86_vm5 = vcmask 785408   ;;  %p496_p3 = por %p495_p2, %p494_p1 }
   0xc   :  { %vm439_vm12 = vmpackc.low %vm110_vm9, %vm108_vm6  ;;  %vm89_vm6 = vcmask 916480  }
   0xd   :  { %440 = vmatprep.subr.msk.bf16.mxu1 %vm439_vm12, %v521_v16  ;;  %vm107_vm13 = vmand %vm95_vm7, %vm103_vm8  ;;  %p497_p4 = pnand %p496_p3, %p490_p0 }
   0xe   :  { %470 = vrot.lane.b32.xlu1 %v464_v7, %s516_s11  ;;  %460 = vrot.lane.b32.xlu0 %v464_v7, %s517_s12  ;;  %vm109_vm14 = vmand %vm97_vm10, %vm105_vm11 }
   0xf   :  { %vm441_vm15 = vmpackc.low %vm109_vm14, %vm107_vm13 }
  0x10   :  { %442 = vmatpush1.bf16.msk.msra.mxu1 %vm441_vm15, %v521_v16 }
  0x12   :  { %480 = vrot.lane.b32.xlu1 %v464_v7, %s518_s13  ;;  %475 = vrot.lane.b32.xlu0 %v464_v7, %s519_s14 }
  0x16   :  { %485 = vrot.lane.b32.xlu0 %v464_v7, %s520_s15 }
  0x34   :  { %260 = vxpose.xlu0.b32.start [1/2] (short) (narrow) %v14_v17, 32 }
  0x38   :  { %261 = vxpose.xlu0.b32.end [2/2] (short) (narrow) %v15_v18, 32 }
  0x3b   :  { %119 = vxpose.xlu1.b32.start [1/2] (short) (narrow) %v12_v19, 32 }
  0x3f   :  { %120 = vxpose.xlu1.b32.end [2/2] (short) (narrow) %v13_v20, 32 }
  0x7c   :  { %v466_v21 = vpop.permute.xlu1 %465  ;;  %v456_v22 = vpop.permute.xlu0 %455 }
  0x7d   :  { %v458_v23 = vunpack.i.h.bf16 %v456_v22  ;;  %v457_v24 = vunpack.i.l.bf16 %v456_v22  ;;  %v468_v31 = vunpack.i.h.bf16 %v466_v21  ;;  %v467_v32 = vunpack.i.l.bf16 %v466_v21 }
  0x7f   :  { %v73_v25 = vsel %vm71_vm0, %v418_v6, %v458_v23  ;;  %v72_v26 = vsel %vm71_vm0, %v417_v5, %v457_v24 }
  0x80   :  { %v471_v27 = vpop.permute.xlu1 %470  ;;  %v461_v28 = vpop.permute.xlu0 %460 }
  0x81   :  { %v463_v29 = vunpack.i.h.bf16 %v461_v28  ;;  %v462_v30 = vunpack.i.l.bf16 %v461_v28  ;;  %v473_v35 = vunpack.i.h.bf16 %v471_v27  ;;  %v472_v36 = vunpack.i.l.bf16 %v471_v27 }
  0x83   :  { %v75_v33 = vsel %vm74_vm1, %v72_v26, %v462_v30  ;;  %v76_v34 = vsel %vm74_vm1, %v73_v25, %v463_v29 }
  0x84   :  { %v78_v37 = vsel %vm77_vm2, %v75_v33, %v467_v32  ;;  %v79_v38 = vsel %vm77_vm2, %v76_v34, %v468_v31  ;;  %v481_v39 = vpop.permute.xlu1 %480  ;;  %v476_v40 = vpop.permute.xlu0 %475 }
  0x85   :  { %v478_v41 = vunpack.i.h.bf16 %v476_v40  ;;  %v477_v42 = vunpack.i.l.bf16 %v476_v40  ;;  %v483_v43 = vunpack.i.h.bf16 %v481_v39  ;;  %v482_v44 = vunpack.i.l.bf16 %v481_v39 }
  0x86   :  { %v81_v45 = vsel %vm80_vm3, %v78_v37, %v472_v36  ;;  %v82_v46 = vsel %vm80_vm3, %v79_v38, %v473_v35 }
  0x87   :  { %v84_v47 = vsel %vm83_vm4, %v81_v45, %v477_v42  ;;  %v85_v48 = vsel %vm83_vm4, %v82_v46, %v478_v41 }
  0x88   :  { %v486_v49 = vpop.permute.xlu0 %485  ;;  %v87_v52 = vsel %vm86_vm5, %v84_v47, %v482_v44  ;;  %v88_v53 = vsel %vm86_vm5, %v85_v48, %v483_v43 }
  0x89   :  { %v488_v50 = vunpack.i.h.bf16 %v486_v49  ;;  %v487_v51 = vunpack.i.l.bf16 %v486_v49 }
  0x8b   :  { %v90_v54 = vsel %vm89_vm6, %v87_v52, %v487_v51  ;;  %v91_v55 = vsel %vm89_vm6, %v88_v53, %v488_v50 }
  0x8c   :  { %v435_v56 = vpack.c.bf16 %v91_v55, %v90_v54 }
  0x8e   :  { %436 = vmatprep.subr.bf16.mxu0 %v435_v56 }
  0x8f   :  { %438 = vmatpush1.bf16.msra.mxu0 %v435_v56 }
  0xb4   :  { %v276_v57 = vpop.trf.xlu0 }
  0xb5   :  { %431 = vmatmul.mubr.msk.f32.vlgmr.msra.gmra.mrb[0].mxu1 %vm71_vm0, %v276_v57 }
  0xb6   :  { %374 = vmatprep.mubr.f32.mxu1 %v513_v1 }
  0xb8   :  { %v277_v58 = vpop.trf.xlu0 }
  0xb9   :  { %432 = vmatmul.mubr.msk.f32.gmra.mrb[2].mxu1 %vm71_vm0, %v277_v58 }
  0xba   :  { %380 = vmatprep.mubr.f32.mxu1 %v513_v1 }
  0xbb   :  { %v135_v59 = vpop.trf.xlu1 }
  0xbc   :  { %423 = vmatmul.mubr.msk.f32.vlgmr.msra.gmra.mrb[0].mxu0 %vm71_vm0, %v135_v59  ;;  %v278_v60 = vpop.trf.xlu0 }
  0xbd   :  { %233 = vmatprep.mubr.f32.mxu0 %v513_v1  ;;  %433 = vmatmul.mubr.msk.f32.gmra.mrb[4].mxu1 %vm71_vm0, %v278_v60 }
  0xbe   :  { %386 = vmatprep.mubr.f32.mxu1 %v513_v1 }
  0xbf   :  { %v136_v61 = vpop.trf.xlu1 }
  0xc0   :  { %424 = vmatmul.mubr.msk.f32.gmra.mrb[2].mxu0 %vm71_vm0, %v136_v61  ;;  %v279_v62 = vpop.trf.xlu0 }
  0xc1   :  { %239 = vmatprep.mubr.f32.mxu0 %v513_v1  ;;  %434 = vmatmul.mubr.msk.f32.gmra.mrb[6].mxu1 %vm71_vm0, %v279_v62 }
  0xc3   :  { %v137_v63 = vpop.trf.xlu1 }
  0xc4   :  { %425 = vmatmul.mubr.msk.f32.gmra.mrb[4].mxu0 %vm71_vm0, %v137_v63 }
  0xc5   :  { %245 = vmatprep.mubr.f32.mxu0 %v513_v1 }
  0xc7   :  { %v138_v0 = vpop.trf.xlu1 }
  0xc8   :  { %426 = vmatmul.mubr.msk.f32.gmra.mrb[6].mxu0 %vm71_vm0, %v138_v0 }
 0x188   :  { %v370_v2 = vpop.f32.mrb[0].mxu1 }
 0x189   :  { %393 = vst [vmem:[#allocation2 + $0x40] sm:$0xff] %v370_v2  ;;  %v372_v3 = vpop.f32.mrb[1].mxu1 }
 0x18a   :  { %394 = vst [vmem:[#allocation2 + $0x48] sm:$0xff] %v372_v3 }
 0x18c   :  { %v376_v4 = vpop.f32.mrb[2].mxu1 }
 0x18d   :  { %395 = vst [vmem:[#allocation2 + $0x50] sm:$0xff] %v376_v4  ;;  %v378_v5 = vpop.f32.mrb[3].mxu1 }
 0x18e   :  { %396 = vst [vmem:[#allocation2 + $0x58] sm:$0xff] %v378_v5 }
 0x18f   :  { %v229_v6 = vpop.f32.mrb[0].mxu0 }
 0x190   :  { %252 = vst [vmem:[#allocation2] sm:$0xff] %v229_v6  ;;  %v231_v7 = vpop.f32.mrb[1].mxu0  ;;  %v382_v8 = vpop.f32.mrb[4].mxu1 }
 0x191   :  { %253 = vst [vmem:[#allocation2 + $0x8] sm:$0xff] %v231_v7  ;;  %397 = vst [vmem:[#allocation2 + $0x60] sm:$0xff] %v382_v8  ;;  %v384_v9 = vpop.f32.mrb[5].mxu1 }
 0x192   :  { %398 = vst [vmem:[#allocation2 + $0x68] sm:$0xff] %v384_v9 }
 0x193   :  { %v235_v1 = vpop.f32.mrb[2].mxu0 }
 0x194   :  { %254 = vst [vmem:[#allocation2 + $0x10] sm:$0xff] %v235_v1  ;;  %v237_v10 = vpop.f32.mrb[3].mxu0  ;;  %v388_v11 = vpop.f32.mrb[6].mxu1 }
 0x195   :  { %255 = vst [vmem:[#allocation2 + $0x18] sm:$0xff] %v237_v10  ;;  %399 = vst [vmem:[#allocation2 + $0x70] sm:$0xff] %v388_v11  ;;  %v390_v12 = vpop.f32.mrb[7].mxu1 }
 0x196   :  { %400 = vst [vmem:[#allocation2 + $0x78] sm:$0xff] %v390_v12 }
 0x197   :  { %v241_v13 = vpop.f32.mrb[4].mxu0 }
 0x198   :  { %256 = vst [vmem:[#allocation2 + $0x20] sm:$0xff] %v241_v13  ;;  %v243_v14 = vpop.f32.mrb[5].mxu0 }
 0x199   :  { %257 = vst [vmem:[#allocation2 + $0x28] sm:$0xff] %v243_v14 }
 0x19b   :  { %v247_v15 = vpop.f32.mrb[6].mxu0 }
 0x19c   :  { %258 = vst [vmem:[#allocation2 + $0x30] sm:$0xff] %v247_v15  ;;  %v249_v16 = vpop.f32.mrb[7].mxu0 }
 0x19d   :  { %259 = vst [vmem:[#allocation2 + $0x38] sm:$0xff] %v249_v16 }
 0x19e   :  { %500 = shalt.err (!%p497_p4)
}
 0x19f   :  { %s501_s27 = scalar_lea.hbm %s593_s2, 2048 }
 0x1a0   :  { %p502_p5 = scmp.ne.s32.totalorder %s593_s2, %s501_s27  ;;  %p505_p6 = scmp.lt.u32.totalorder %s501_s27, %s593_s2 }
 0x1a2   :  { %p507_p7 = pnand %p505_p6, %p502_p5 }
 0x1a4   :  { %510 = shalt.err (!%p507_p7)
}
 0x1a5   :  { %s523_s4 = smov 256  }
 0x1a6   :  { %412 = dma.vmem_to_hbm [thread:$0]  %s407_s1, 2048, %s593_s2, [#allocation3], %s523_s4, %s523_s4, %s515_s10  }
 0x1a7   :  { %511 = dma.done.wait [#allocation3], 2048  }
 0x1a8   :  { %512 = vsyncadd [#allocation3], 4294965248 }
 0x1a9   :  { %416 = vsyncpa [#allocation3], 1 }

</bundles_post_ra>
